<compile_context>
chip_gen: v5e
topology: v5e:2x2
jax: 0.10.0
libtpu: 0.0.40
codegen_flags: <defaults>
</compile_context>

<pallas_src>
import math
import functools

import jax
import jax.numpy as jnp
from jax.experimental import pallas as pl
from jax.experimental.pallas import tpu as pltpu

_COMPUTE_DTYPE = jnp.bfloat16
_VMEM_LIMIT = 48 * 1024 * 1024


def _pick_tile(S, target=128):
    """Largest sequence tile <= target that divides S (8-aligned when possible)."""
    if S % target == 0:
        return target
    for t in range(min(S, target), 0, -1):
        if S % t == 0 and (t % 8 == 0 or t == S):
            return t
    return S


# --------------------------------------------------------------------------
# Kernel 1: fused QKV projection (full-D contraction, bf16 operands, f32 acc)
# --------------------------------------------------------------------------
def _qkv_proj_kernel(x_ref, wq_ref, wk_ref, wv_ref, bq_ref, bk_ref, bv_ref,
                     q_ref, k_ref, v_ref):
    x = x_ref[0]                                                  # (ts, D) bf16
    q = jnp.dot(x, wq_ref[...], preferred_element_type=jnp.float32) + bq_ref[...]
    k = jnp.dot(x, wk_ref[...], preferred_element_type=jnp.float32) + bk_ref[...]
    v = jnp.dot(x, wv_ref[...], preferred_element_type=jnp.float32) + bv_ref[...]
    q_ref[0] = q.astype(q_ref.dtype)   # q already scaled (folded into weights)
    k_ref[0] = k.astype(k_ref.dtype)
    v_ref[0] = v.astype(v_ref.dtype)


# --------------------------------------------------------------------------
# Kernel 2: flash attention with online softmax, heads batched in the block
# --------------------------------------------------------------------------
def _flash_attn_kernel(q_ref, k_ref, v_ref, o_ref, m_sc, l_sc, acc_sc, *, causal):
    # q_ref: (1, H, tq, dh)   k_ref/v_ref: (1, H, tk, dh)   o_ref: (1, tq, D)
    ki = pl.program_id(2)

    @pl.when(ki == 0)
    def _():
        m_sc[...] = jnp.full_like(m_sc, -jnp.inf)
        l_sc[...] = jnp.zeros_like(l_sc)
        acc_sc[...] = jnp.zeros_like(acc_sc)

    q = q_ref[0]                       # (H, tq, dh) bf16, pre-scaled by 1/sqrt(dh)
    k = k_ref[0]                       # (H, tk, dh) bf16
    v = v_ref[0]                       # (H, tk, dh) bf16
    H, tq, _ = q.shape
    tk = k.shape[1]

    # scores for all heads at once (batched matmul on the MXU, f32 accumulate)
    s = jnp.einsum("hqd,hkd->hqk", q, k,
                   preferred_element_type=jnp.float32)            # (H, tq, tk)

    if causal:
        # Mask built once per grid step (shared by every head).
        qi = pl.program_id(1)
        row = jax.lax.broadcasted_iota(jnp.int32, (tq, tk), 0) + qi * tq
        col = jax.lax.broadcasted_iota(jnp.int32, (tq, tk), 1) + ki * tk
        s = jnp.where((col > row)[None, :, :], -jnp.inf, s)

    # online softmax update
    m_prev = m_sc[...]                                            # (H, tq, 1)
    m_new = jnp.maximum(m_prev, s.max(axis=-1, keepdims=True))
    alpha = jnp.exp(m_prev - m_new)
    p = jnp.exp(s - m_new)                                        # (H, tq, tk) f32
    l_sc[...] = alpha * l_sc[...] + p.sum(axis=-1, keepdims=True)
    acc_sc[...] = alpha * acc_sc[...] + jnp.einsum(
        "hqk,hkd->hqd", p.astype(v.dtype), v,
        preferred_element_type=jnp.float32)
    m_sc[...] = m_new

    @pl.when(ki == pl.num_programs(2) - 1)
    def _():
        # normalize once at the end; reciprocal goes to the EUP slot
        out = acc_sc[...] * pl.reciprocal(l_sc[...], approx=True)  # (H, tq, dh)
        merged = jnp.concatenate([out[h] for h in range(H)], axis=-1)  # (tq, D)
        o_ref[0] = merged.astype(o_ref.dtype)


# --------------------------------------------------------------------------
# Kernel 3: output projection (full-D contraction)
# --------------------------------------------------------------------------
def _out_proj_kernel(ctx_ref, w_ref, b_ref, o_ref):
    y = jnp.dot(ctx_ref[0], w_ref[...],
                preferred_element_type=jnp.float32) + b_ref[...]
    o_ref[0] = y.astype(o_ref.dtype)


# --------------------------------------------------------------------------
# Wrapper
# --------------------------------------------------------------------------
@functools.partial(jax.jit, static_argnames=("n_heads", "causal_mask"))
def self_attention(x, w_in, b_in, w_out, b_out, *, n_heads, causal_mask=False):
    """x: (B, S, D). w_in: (3D, D), w_out: (D, D) in PyTorch nn.Linear layout."""
    B, S, D = x.shape
    d_head = D // n_heads
    out_dtype = x.dtype
    cdt = _COMPUTE_DTYPE
    scale = 1.0 / math.sqrt(d_head)

    # ---- weight prep (plain JAX glue; constant under jit) -----------------
    wq_t = (w_in[0 * D:1 * D].T * scale).astype(cdt)  # scale folded into q proj
    wk_t = w_in[1 * D:2 * D].T.astype(cdt)
    wv_t = w_in[2 * D:3 * D].T.astype(cdt)
    bq = (b_in[0 * D:1 * D] * scale).astype(jnp.float32).reshape(1, D)
    bk = b_in[1 * D:2 * D].astype(jnp.float32).reshape(1, D)
    bv = b_in[2 * D:3 * D].astype(jnp.float32).reshape(1, D)
    w_out_t = w_out.T.astype(cdt)
    b_out2 = b_out.astype(jnp.float32).reshape(1, D)
    x_c = x.astype(cdt)

    ts = _pick_tile(S)
    n_s = S // ts

    cparams_2d = pltpu.CompilerParams(
        dimension_semantics=("parallel", "parallel"),
        vmem_limit_bytes=_VMEM_LIMIT)

    # ---- 1) QKV projection -------------------------------------------------
    q, k, v = pl.pallas_call(
        _qkv_proj_kernel,
        out_shape=[jax.ShapeDtypeStruct((B, S, D), cdt),
                   jax.ShapeDtypeStruct((B, S, D), cdt),
                   jax.ShapeDtypeStruct((B, S, D), cdt)],
        grid_spec=pltpu.PrefetchScalarGridSpec(
            num_scalar_prefetch=0,
            grid=(B, n_s),
            in_specs=[
                pl.BlockSpec((1, ts, D), lambda b, s: (b, s, 0)),   # x tile
                pl.BlockSpec((D, D), lambda b, s: (0, 0)),          # Wq^T (scaled)
                pl.BlockSpec((D, D), lambda b, s: (0, 0)),          # Wk^T
                pl.BlockSpec((D, D), lambda b, s: (0, 0)),          # Wv^T
                pl.BlockSpec((1, D), lambda b, s: (0, 0)),          # bq (scaled)
                pl.BlockSpec((1, D), lambda b, s: (0, 0)),          # bk
                pl.BlockSpec((1, D), lambda b, s: (0, 0)),          # bv
            ],
            out_specs=[pl.BlockSpec((1, ts, D), lambda b, s: (b, s, 0)),
                       pl.BlockSpec((1, ts, D), lambda b, s: (b, s, 0)),
                       pl.BlockSpec((1, ts, D), lambda b, s: (b, s, 0))],
        ),
        compiler_params=cparams_2d,
    )(x_c, wq_t, wk_t, wv_t, bq, bk, bv)

    # ---- head-major layout (B, H, S, dh); one-time XLA layout glue ---------
    def to_heads(t):
        return t.reshape(B, S, n_heads, d_head).transpose(0, 2, 1, 3)
    qh, kh, vh = to_heads(q), to_heads(k), to_heads(v)

    # ---- 2) flash attention -------------------------------------------------
    tq = tkv = ts
    n_q = S // tq
    n_kv = S // tkv

    ctx = pl.pallas_call(
        functools.partial(_flash_attn_kernel, causal=bool(causal_mask)),
        out_shape=jax.ShapeDtypeStruct((B, S, D), cdt),
        grid_spec=pltpu.PrefetchScalarGridSpec(
            num_scalar_prefetch=0,
            grid=(B, n_q, n_kv),
            in_specs=[
                pl.BlockSpec((1, n_heads, tq, d_head),
                             lambda b, qi, ki: (b, 0, qi, 0)),      # q tile
                pl.BlockSpec((1, n_heads, tkv, d_head),
                             lambda b, qi, ki: (b, 0, ki, 0)),      # k tile
                pl.BlockSpec((1, n_heads, tkv, d_head),
                             lambda b, qi, ki: (b, 0, ki, 0)),      # v tile
            ],
            out_specs=pl.BlockSpec((1, tq, D), lambda b, qi, ki: (b, qi, 0)),
            scratch_shapes=[
                pltpu.VMEM((n_heads, tq, 1), jnp.float32),          # running max m
                pltpu.VMEM((n_heads, tq, 1), jnp.float32),          # running sum l
                pltpu.VMEM((n_heads, tq, d_head), jnp.float32),     # acc
            ],
        ),
        compiler_params=pltpu.CompilerParams(
            dimension_semantics=("parallel", "parallel", "arbitrary"),
            vmem_limit_bytes=_VMEM_LIMIT),
    )(qh, kh, vh)

    # ---- 3) output projection ----------------------------------------------
    y = pl.pallas_call(
        _out_proj_kernel,
        out_shape=jax.ShapeDtypeStruct((B, S, D), out_dtype),
        grid_spec=pltpu.PrefetchScalarGridSpec(
            num_scalar_prefetch=0,
            grid=(B, n_s),
            in_specs=[
                pl.BlockSpec((1, ts, D), lambda b, s: (b, s, 0)),   # attention out
                pl.BlockSpec((D, D), lambda b, s: (0, 0)),          # W_out^T
                pl.BlockSpec((1, D), lambda b, s: (0, 0)),          # b_out
            ],
            out_specs=pl.BlockSpec((1, ts, D), lambda b, s: (b, s, 0)),
        ),
        compiler_params=cparams_2d,
    )(ctx, w_out_t, b_out2)

    return y


# --------------------------------------------------------------------------
# Pure-JAX reference (f32) replicating the PyTorch forward
# --------------------------------------------------------------------------
def _reference(x, w_in, b_in, w_out, b_out, n_heads, causal_mask):
    B, S, D = x.shape
    d_head = D // n_heads
    qkv = x @ w_in.T + b_in
    q, k, v = jnp.split(qkv, 3, axis=-1)
    q = q.reshape(B, S, n_heads, d_head).transpose(0, 2, 1, 3)
    k = k.reshape(B, S, n_heads, d_head).transpose(0, 2, 1, 3)
    v = v.reshape(B, S, n_heads, d_head).transpose(0, 2, 1, 3)
    w = jnp.einsum("bhqd,bhkd->bhqk", q, k)
    if causal_mask:
        mask = jnp.triu(jnp.ones((S, S), dtype=bool), 1)
        w = jnp.where(mask, -jnp.inf, w)
    w = w / math.sqrt(d_head)
    w = jax.nn.softmax(w, axis=-1)
    out = jnp.einsum("bhqk,bhkd->bhqd", w, v)
    out = out.transpose(0, 2, 1, 3).reshape(B, S, D)
    return out @ w_out.T + b_out


if __name__ == "__main__":
    # Small shapes consistent with the module's forward: (B, S, D)
    B, S, D = 2, 8, 32
    n_heads = 4

    key = jax.random.PRNGKey(0)
    kx, kwi, kbi, kwo, kbo = jax.random.split(key, 5)

    x = jax.random.normal(kx, (B, S, D), dtype=jnp.float32)
    w_in = jax.random.normal(kwi, (3 * D, D), dtype=jnp.float32) * 0.05
    b_in = jax.random.normal(kbi, (3 * D,), dtype=jnp.float32) * 0.05
    w_out = jax.random.normal(kwo, (D, D), dtype=jnp.float32) * 0.05
    b_out = jax.random.normal(kbo, (D,), dtype=jnp.float32) * 0.05

    for causal in (False, True):
        y = self_attention(x, w_in, b_in, w_out, b_out,
                           n_heads=n_heads, causal_mask=causal)
        y = jax.block_until_ready(y)
        y_ref = _reference(x, w_in, b_in, w_out, b_out, n_heads, causal)
        max_err = float(jnp.max(jnp.abs(y - y_ref)))
        # bf16 MXU operands (f32 accumulation) + approx reciprocal -> loosened tol
        assert jnp.allclose(y, y_ref, atol=1e-2, rtol=1e-2), (
            f"mismatch vs reference (causal={causal}, max_err={max_err})")

    print("KERNEL_OK")
</pallas_src>

<mosaic_0001>
module attributes {stable_mosaic.version = 11 : i64} {
  func.func @_qkv_proj_kernel(%arg0: i32, %arg1: i32, %arg2: memref<1x8x32xbf16, #tpu.memory_space<vmem>>, %arg3: memref<32x32xbf16, #tpu.memory_space<vmem>>, %arg4: memref<32x32xbf16, #tpu.memory_space<vmem>>, %arg5: memref<32x32xbf16, #tpu.memory_space<vmem>>, %arg6: memref<1x32xf32, #tpu.memory_space<vmem>>, %arg7: memref<1x32xf32, #tpu.memory_space<vmem>>, %arg8: memref<1x32xf32, #tpu.memory_space<vmem>>, %arg9: memref<1x8x32xbf16, #tpu.memory_space<vmem>>, %arg10: memref<1x8x32xbf16, #tpu.memory_space<vmem>>, %arg11: memref<1x8x32xbf16, #tpu.memory_space<vmem>>) attributes {dimension_semantics = [#tpu.dimension_semantics<parallel>, #tpu.dimension_semantics<parallel>], iteration_bounds = array<i64: 2, 1>, scalar_prefetch = 0 : i64, scratch_operands = 0 : i64, tpu.core_type = #tpu.core_type<tc>, window_params = [{transform_indices = @transform_0, window_bounds = array<i64: 1, 8, 32>}, {pipeline_mode = #tpu.pipeline_mode<synchronous>, transform_indices = @transform_1, window_bounds = array<i64: 32, 32>}, {pipeline_mode = #tpu.pipeline_mode<synchronous>, transform_indices = @transform_2, window_bounds = array<i64: 32, 32>}, {pipeline_mode = #tpu.pipeline_mode<synchronous>, transform_indices = @transform_3, window_bounds = array<i64: 32, 32>}, {pipeline_mode = #tpu.pipeline_mode<synchronous>, transform_indices = @transform_4, window_bounds = array<i64: 1, 32>}, {pipeline_mode = #tpu.pipeline_mode<synchronous>, transform_indices = @transform_5, window_bounds = array<i64: 1, 32>}, {pipeline_mode = #tpu.pipeline_mode<synchronous>, transform_indices = @transform_6, window_bounds = array<i64: 1, 32>}, {transform_indices = @transform_7, window_bounds = array<i64: 1, 8, 32>}, {transform_indices = @transform_8, window_bounds = array<i64: 1, 8, 32>}, {transform_indices = @transform_9, window_bounds = array<i64: 1, 8, 32>}]} {
    %c0 = arith.constant 0 : index
    %c0_0 = arith.constant 0 : index
    %c0_1 = arith.constant 0 : index
    %0 = vector.load %arg2[%c0, %c0_0, %c0_1] : memref<1x8x32xbf16, #tpu.memory_space<vmem>>, vector<1x8x32xbf16>
    %1 = vector.shape_cast %0 : vector<1x8x32xbf16> to vector<8x32xbf16>
    %c0_2 = arith.constant 0 : index
    %c0_3 = arith.constant 0 : index
    %2 = vector.load %arg3[%c0_2, %c0_3] : memref<32x32xbf16, #tpu.memory_space<vmem>>, vector<32x32xbf16>
    %cst = arith.constant dense<0.000000e+00> : vector<8x32xf32>
    %3 = tpu.matmul %1, %2, %cst {dimension_numbers = #tpu.dot_dimension_numbers<[1], [0], [0], [1], [0, 0, 1, 1], [], []>} : vector<8x32xbf16>, vector<32x32xbf16>, vector<8x32xf32> -> vector<8x32xf32>
    %c0_4 = arith.constant 0 : index
    %c0_5 = arith.constant 0 : index
    %4 = vector.load %arg6[%c0_4, %c0_5] : memref<1x32xf32, #tpu.memory_space<vmem>>, vector<1x32xf32>
    %5 = vector.broadcast %4 : vector<1x32xf32> to vector<8x32xf32>
    %6 = arith.addf %3, %5 : vector<8x32xf32>
    %c0_6 = arith.constant 0 : index
    %c0_7 = arith.constant 0 : index
    %7 = vector.load %arg4[%c0_6, %c0_7] : memref<32x32xbf16, #tpu.memory_space<vmem>>, vector<32x32xbf16>
    %cst_8 = arith.constant dense<0.000000e+00> : vector<8x32xf32>
    %8 = tpu.matmul %1, %7, %cst_8 {dimension_numbers = #tpu.dot_dimension_numbers<[1], [0], [0], [1], [0, 0, 1, 1], [], []>} : vector<8x32xbf16>, vector<32x32xbf16>, vector<8x32xf32> -> vector<8x32xf32>
    %c0_9 = arith.constant 0 : index
    %c0_10 = arith.constant 0 : index
    %9 = vector.load %arg7[%c0_9, %c0_10] : memref<1x32xf32, #tpu.memory_space<vmem>>, vector<1x32xf32>
    %10 = vector.broadcast %9 : vector<1x32xf32> to vector<8x32xf32>
    %11 = arith.addf %8, %10 : vector<8x32xf32>
    %c0_11 = arith.constant 0 : index
    %c0_12 = arith.constant 0 : index
    %12 = vector.load %arg5[%c0_11, %c0_12] : memref<32x32xbf16, #tpu.memory_space<vmem>>, vector<32x32xbf16>
    %cst_13 = arith.constant dense<0.000000e+00> : vector<8x32xf32>
    %13 = tpu.matmul %1, %12, %cst_13 {dimension_numbers = #tpu.dot_dimension_numbers<[1], [0], [0], [1], [0, 0, 1, 1], [], []>} : vector<8x32xbf16>, vector<32x32xbf16>, vector<8x32xf32> -> vector<8x32xf32>
    %c0_14 = arith.constant 0 : index
    %c0_15 = arith.constant 0 : index
    %14 = vector.load %arg8[%c0_14, %c0_15] : memref<1x32xf32, #tpu.memory_space<vmem>>, vector<1x32xf32>
    %15 = vector.broadcast %14 : vector<1x32xf32> to vector<8x32xf32>
    %16 = arith.addf %13, %15 : vector<8x32xf32>
    %17 = arith.truncf %6 : vector<8x32xf32> to vector<8x32xbf16>
    %c0_16 = arith.constant 0 : index
    %c0_17 = arith.constant 0 : index
    %c0_18 = arith.constant 0 : index
    %18 = vector.load %arg9[%c0_16, %c0_17, %c0_18] : memref<1x8x32xbf16, #tpu.memory_space<vmem>>, vector<1x8x32xbf16>
    %19 = vector.shape_cast %18 : vector<1x8x32xbf16> to vector<8x32xbf16>
    %20 = vector.shape_cast %17 : vector<8x32xbf16> to vector<1x8x32xbf16>
    tpu.vector_store %arg9[%c0_16, %c0_17, %c0_18], %20 {strides = array<i32>} : memref<1x8x32xbf16, #tpu.memory_space<vmem>>, vector<1x8x32xbf16>,
    %21 = arith.truncf %11 : vector<8x32xf32> to vector<8x32xbf16>
    %c0_19 = arith.constant 0 : index
    %c0_20 = arith.constant 0 : index
    %c0_21 = arith.constant 0 : index
    %22 = vector.load %arg10[%c0_19, %c0_20, %c0_21] : memref<1x8x32xbf16, #tpu.memory_space<vmem>>, vector<1x8x32xbf16>
    %23 = vector.shape_cast %22 : vector<1x8x32xbf16> to vector<8x32xbf16>
    %24 = vector.shape_cast %21 : vector<8x32xbf16> to vector<1x8x32xbf16>
    tpu.vector_store %arg10[%c0_19, %c0_20, %c0_21], %24 {strides = array<i32>} : memref<1x8x32xbf16, #tpu.memory_space<vmem>>, vector<1x8x32xbf16>,
    %25 = arith.truncf %16 : vector<8x32xf32> to vector<8x32xbf16>
    %c0_22 = arith.constant 0 : index
    %c0_23 = arith.constant 0 : index
    %c0_24 = arith.constant 0 : index
    %26 = vector.load %arg11[%c0_22, %c0_23, %c0_24] : memref<1x8x32xbf16, #tpu.memory_space<vmem>>, vector<1x8x32xbf16>
    %27 = vector.shape_cast %26 : vector<1x8x32xbf16> to vector<8x32xbf16>
    %28 = vector.shape_cast %25 : vector<8x32xbf16> to vector<1x8x32xbf16>
    tpu.vector_store %arg11[%c0_22, %c0_23, %c0_24], %28 {strides = array<i32>} : memref<1x8x32xbf16, #tpu.memory_space<vmem>>, vector<1x8x32xbf16>,
    return
  }
  func.func @transform_0(%arg0: i32, %arg1: i32) -> (i32, i32, i32) {
    %c0_i32 = arith.constant 0 : i32
    %c0_i32_0 = arith.constant 0 : i32
    return %arg0, %arg1, %c0_i32 : i32, i32, i32
  }
  func.func @transform_1(%arg0: i32, %arg1: i32) -> (i32, i32) {
    %c0_i32 = arith.constant 0 : i32
    %c0_i32_0 = arith.constant 0 : i32
    %c0_i32_1 = arith.constant 0 : i32
    return %c0_i32, %c0_i32_0 : i32, i32
  }
  func.func @transform_2(%arg0: i32, %arg1: i32) -> (i32, i32) {
    %c0_i32 = arith.constant 0 : i32
    %c0_i32_0 = arith.constant 0 : i32
    %c0_i32_1 = arith.constant 0 : i32
    return %c0_i32, %c0_i32_0 : i32, i32
  }
  func.func @transform_3(%arg0: i32, %arg1: i32) -> (i32, i32) {
    %c0_i32 = arith.constant 0 : i32
    %c0_i32_0 = arith.constant 0 : i32
    %c0_i32_1 = arith.constant 0 : i32
    return %c0_i32, %c0_i32_0 : i32, i32
  }
  func.func @transform_4(%arg0: i32, %arg1: i32) -> (i32, i32) {
    %c0_i32 = arith.constant 0 : i32
    %c0_i32_0 = arith.constant 0 : i32
    %c0_i32_1 = arith.constant 0 : i32
    return %c0_i32, %c0_i32_0 : i32, i32
  }
  func.func @transform_5(%arg0: i32, %arg1: i32) -> (i32, i32) {
    %c0_i32 = arith.constant 0 : i32
    %c0_i32_0 = arith.constant 0 : i32
    %c0_i32_1 = arith.constant 0 : i32
    return %c0_i32, %c0_i32_0 : i32, i32
  }
  func.func @transform_6(%arg0: i32, %arg1: i32) -> (i32, i32) {
    %c0_i32 = arith.constant 0 : i32
    %c0_i32_0 = arith.constant 0 : i32
    %c0_i32_1 = arith.constant 0 : i32
    return %c0_i32, %c0_i32_0 : i32, i32
  }
  func.func @transform_7(%arg0: i32, %arg1: i32) -> (i32, i32, i32) {
    %c0_i32 = arith.constant 0 : i32
    %c0_i32_0 = arith.constant 0 : i32
    return %arg0, %arg1, %c0_i32 : i32, i32, i32
  }
  func.func @transform_8(%arg0: i32, %arg1: i32) -> (i32, i32, i32) {
    %c0_i32 = arith.constant 0 : i32
    %c0_i32_0 = arith.constant 0 : i32
    return %arg0, %arg1, %c0_i32 : i32, i32, i32
  }
  func.func @transform_9(%arg0: i32, %arg1: i32) -> (i32, i32, i32) {
    %c0_i32 = arith.constant 0 : i32
    %c0_i32_0 = arith.constant 0 : i32
    return %arg0, %arg1, %c0_i32 : i32, i32, i32
  }
}

module attributes {stable_mosaic.version = 11 : i64} {
  func.func @_flash_attn_kernel(%arg0: i32, %arg1: i32, %arg2: i32, %arg3: memref<1x4x8x8xbf16, #tpu.memory_space<vmem>>, %arg4: memref<1x4x8x8xbf16, #tpu.memory_space<vmem>>, %arg5: memref<1x4x8x8xbf16, #tpu.memory_space<vmem>>, %arg6: memref<1x8x32xbf16, #tpu.memory_space<vmem>>, %arg7: memref<4x8x1xf32, #tpu.memory_space<vmem>>, %arg8: memref<4x8x1xf32, #tpu.memory_space<vmem>>, %arg9: memref<4x8x8xf32, #tpu.memory_space<vmem>>) attributes {dimension_semantics = [#tpu.dimension_semantics<parallel>, #tpu.dimension_semantics<parallel>, #tpu.dimension_semantics<arbitrary>], iteration_bounds = array<i64: 2, 1, 1>, scalar_prefetch = 0 : i64, scratch_operands = 3 : i64, tpu.core_type = #tpu.core_type<tc>, window_params = [{transform_indices = @transform_0, window_bounds = array<i64: 1, 4, 8, 8>}, {transform_indices = @transform_1, window_bounds = array<i64: 1, 4, 8, 8>}, {transform_indices = @transform_2, window_bounds = array<i64: 1, 4, 8, 8>}, {transform_indices = @transform_3, window_bounds = array<i64: 1, 8, 32>}]} {
    %c0_i32 = arith.constant 0 : i32
    %0 = arith.cmpi eq, %arg2, %c0_i32 : i32
    %1 = arith.extui %0 : i1 to i32
    %c0_i32_0 = arith.constant 0 : i32
    %2 = arith.cmpi ne, %1, %c0_i32_0 : i32
    scf.if %2 {
      %cst_35 = arith.constant 0xFF800000 : f32
      %36 = vector.broadcast %cst_35 : f32 to vector<4x8x1xf32>
      %c0_36 = arith.constant 0 : index
      %c0_37 = arith.constant 0 : index
      %c0_38 = arith.constant 0 : index
      %37 = vector.load %arg7[%c0_36, %c0_37, %c0_38] : memref<4x8x1xf32, #tpu.memory_space<vmem>>, vector<4x8x1xf32>
      tpu.vector_store %arg7[%c0_36, %c0_37, %c0_38], %36 {strides = array<i32>} : memref<4x8x1xf32, #tpu.memory_space<vmem>>, vector<4x8x1xf32>,
      %cst_39 = arith.constant 0.000000e+00 : f32
      %38 = vector.broadcast %cst_39 : f32 to vector<4x8x1xf32>
      %c0_40 = arith.constant 0 : index
      %c0_41 = arith.constant 0 : index
      %c0_42 = arith.constant 0 : index
      %39 = vector.load %arg8[%c0_40, %c0_41, %c0_42] : memref<4x8x1xf32, #tpu.memory_space<vmem>>, vector<4x8x1xf32>
      tpu.vector_store %arg8[%c0_40, %c0_41, %c0_42], %38 {strides = array<i32>} : memref<4x8x1xf32, #tpu.memory_space<vmem>>, vector<4x8x1xf32>,
      %cst_43 = arith.constant 0.000000e+00 : f32
      %40 = vector.broadcast %cst_43 : f32 to vector<4x8x8xf32>
      %c0_44 = arith.constant 0 : index
      %c0_45 = arith.constant 0 : index
      %c0_46 = arith.constant 0 : index
      %41 = vector.load %arg9[%c0_44, %c0_45, %c0_46] : memref<4x8x8xf32, #tpu.memory_space<vmem>>, vector<4x8x8xf32>
      tpu.vector_store %arg9[%c0_44, %c0_45, %c0_46], %40 {strides = array<i32>} : memref<4x8x8xf32, #tpu.memory_space<vmem>>, vector<4x8x8xf32>,
    } else {
    }
    %c0 = arith.constant 0 : index
    %c0_1 = arith.constant 0 : index
    %c0_2 = arith.constant 0 : index
    %c0_3 = arith.constant 0 : index
    %3 = vector.load %arg3[%c0, %c0_1, %c0_2, %c0_3] : memref<1x4x8x8xbf16, #tpu.memory_space<vmem>>, vector<1x4x8x8xbf16>
    %4 = vector.shape_cast %3 : vector<1x4x8x8xbf16> to vector<4x8x8xbf16>
    %c0_4 = arith.constant 0 : index
    %c0_5 = arith.constant 0 : index
    %c0_6 = arith.constant 0 : index
    %c0_7 = arith.constant 0 : index
    %5 = vector.load %arg4[%c0_4, %c0_5, %c0_6, %c0_7] : memref<1x4x8x8xbf16, #tpu.memory_space<vmem>>, vector<1x4x8x8xbf16>
    %6 = vector.shape_cast %5 : vector<1x4x8x8xbf16> to vector<4x8x8xbf16>
    %c0_8 = arith.constant 0 : index
    %c0_9 = arith.constant 0 : index
    %c0_10 = arith.constant 0 : index
    %c0_11 = arith.constant 0 : index
    %7 = vector.load %arg5[%c0_8, %c0_9, %c0_10, %c0_11] : memref<1x4x8x8xbf16, #tpu.memory_space<vmem>>, vector<1x4x8x8xbf16>
    %8 = vector.shape_cast %7 : vector<1x4x8x8xbf16> to vector<4x8x8xbf16>
    "tpu.trace_start"() <{level = 10 : i32, message = "hqd,hkd->hqk"}> : () -> ()
    %cst = arith.constant dense<0.000000e+00> : vector<4x8x8xf32>
    %9 = tpu.matmul %4, %6, %cst {dimension_numbers = #tpu.dot_dimension_numbers<[2], [2], [1], [1], [0, 0, 0, 1, 1, 1], [0], [0]>} : vector<4x8x8xbf16>, vector<4x8x8xbf16>, vector<4x8x8xf32> -> vector<4x8x8xf32>
    "tpu.trace_stop"() : () -> ()
    %c0_12 = arith.constant 0 : index
    %c0_13 = arith.constant 0 : index
    %c0_14 = arith.constant 0 : index
    %10 = vector.load %arg7[%c0_12, %c0_13, %c0_14] : memref<4x8x1xf32, #tpu.memory_space<vmem>>, vector<4x8x1xf32>
    %cst_15 = arith.constant dense<0xFF800000> : vector<4x8xf32>
    %11 = vector.multi_reduction <maximumf>, %9, %cst_15 [2] : vector<4x8x8xf32> to vector<4x8xf32>
    %12 = vector.shape_cast %11 : vector<4x8xf32> to vector<4x8x1xf32>
    %13 = arith.maximumf %10, %12 : vector<4x8x1xf32>
    %14 = arith.subf %10, %13 : vector<4x8x1xf32>
    %15 = math.exp %14 : vector<4x8x1xf32>
    %16 = vector.broadcast %13 : vector<4x8x1xf32> to vector<4x8x8xf32>
    %17 = arith.subf %9, %16 : vector<4x8x8xf32>
    %18 = math.exp %17 : vector<4x8x8xf32>
    %c0_16 = arith.constant 0 : index
    %c0_17 = arith.constant 0 : index
    %c0_18 = arith.constant 0 : index
    %19 = vector.load %arg8[%c0_16, %c0_17, %c0_18] : memref<4x8x1xf32, #tpu.memory_space<vmem>>, vector<4x8x1xf32>
    %20 = arith.mulf %15, %19 : vector<4x8x1xf32>
    %cst_19 = arith.constant dense<0.000000e+00> : vector<4x8xf32>
    %21 = vector.multi_reduction <add>, %18, %cst_19 [2] : vector<4x8x8xf32> to vector<4x8xf32>
    %22 = vector.shape_cast %21 : vector<4x8xf32> to vector<4x8x1xf32>
    %23 = arith.addf %20, %22 : vector<4x8x1xf32>
    %c0_20 = arith.constant 0 : index
    %c0_21 = arith.constant 0 : index
    %c0_22 = arith.constant 0 : index
    %24 = vector.load %arg8[%c0_20, %c0_21, %c0_22] : memref<4x8x1xf32, #tpu.memory_space<vmem>>, vector<4x8x1xf32>
    tpu.vector_store %arg8[%c0_20, %c0_21, %c0_22], %23 {strides = array<i32>} : memref<4x8x1xf32, #tpu.memory_space<vmem>>, vector<4x8x1xf32>,
    %c0_23 = arith.constant 0 : index
    %c0_24 = arith.constant 0 : index
    %c0_25 = arith.constant 0 : index
    %25 = vector.load %arg9[%c0_23, %c0_24, %c0_25] : memref<4x8x8xf32, #tpu.memory_space<vmem>>, vector<4x8x8xf32>
    %26 = vector.broadcast %15 : vector<4x8x1xf32> to vector<4x8x8xf32>
    %27 = arith.mulf %26, %25 : vector<4x8x8xf32>
    %28 = arith.truncf %18 : vector<4x8x8xf32> to vector<4x8x8xbf16>
    "tpu.trace_start"() <{level = 10 : i32, message = "hqk,hkd->hqd"}> : () -> ()
    %cst_26 = arith.constant dense<0.000000e+00> : vector<4x8x8xf32>
    %29 = tpu.matmul %28, %8, %cst_26 {dimension_numbers = #tpu.dot_dimension_numbers<[2], [1], [1], [2], [0, 0, 0, 1, 1, 2], [0], [0]>} : vector<4x8x8xbf16>, vector<4x8x8xbf16>, vector<4x8x8xf32> -> vector<4x8x8xf32>
    "tpu.trace_stop"() : () -> ()
    %30 = arith.addf %27, %29 : vector<4x8x8xf32>
    %c0_27 = arith.constant 0 : index
    %c0_28 = arith.constant 0 : index
    %c0_29 = arith.constant 0 : index
    %31 = vector.load %arg9[%c0_27, %c0_28, %c0_29] : memref<4x8x8xf32, #tpu.memory_space<vmem>>, vector<4x8x8xf32>
    tpu.vector_store %arg9[%c0_27, %c0_28, %c0_29], %30 {strides = array<i32>} : memref<4x8x8xf32, #tpu.memory_space<vmem>>, vector<4x8x8xf32>,
    %c0_30 = arith.constant 0 : index
    %c0_31 = arith.constant 0 : index
    %c0_32 = arith.constant 0 : index
    %32 = vector.load %arg7[%c0_30, %c0_31, %c0_32] : memref<4x8x1xf32, #tpu.memory_space<vmem>>, vector<4x8x1xf32>
    tpu.vector_store %arg7[%c0_30, %c0_31, %c0_32], %13 {strides = array<i32>} : memref<4x8x1xf32, #tpu.memory_space<vmem>>, vector<4x8x1xf32>,
    %c0_i32_33 = arith.constant 0 : i32
    %33 = arith.cmpi eq, %arg2, %c0_i32_33 : i32
    %34 = arith.extui %33 : i1 to i32
    %c0_i32_34 = arith.constant 0 : i32
    %35 = arith.cmpi ne, %34, %c0_i32_34 : i32
    scf.if %35 {
      %c0_35 = arith.constant 0 : index
      %c0_36 = arith.constant 0 : index
      %c0_37 = arith.constant 0 : index
      %36 = vector.load %arg9[%c0_35, %c0_36, %c0_37] : memref<4x8x8xf32, #tpu.memory_space<vmem>>, vector<4x8x8xf32>
      %c0_38 = arith.constant 0 : index
      %c0_39 = arith.constant 0 : index
      %c0_40 = arith.constant 0 : index
      %37 = vector.load %arg8[%c0_38, %c0_39, %c0_40] : memref<4x8x1xf32, #tpu.memory_space<vmem>>, vector<4x8x1xf32>
      %38 = tpu.reciprocal %37 {approx = true} : vector<4x8x1xf32> -> vector<4x8x1xf32>
      %39 = vector.broadcast %38 : vector<4x8x1xf32> to vector<4x8x8xf32>
      %40 = arith.mulf %36, %39 : vector<4x8x8xf32>
      %41 = vector.extract_strided_slice %40 {offsets = [0, 0, 0], sizes = [1, 8, 8], strides = [1, 1, 1]} : vector<4x8x8xf32> to vector<1x8x8xf32>
      %42 = vector.shape_cast %41 : vector<1x8x8xf32> to vector<8x8xf32>
      %43 = vector.extract_strided_slice %40 {offsets = [1, 0, 0], sizes = [1, 8, 8], strides = [1, 1, 1]} : vector<4x8x8xf32> to vector<1x8x8xf32>
      %44 = vector.shape_cast %43 : vector<1x8x8xf32> to vector<8x8xf32>
      %45 = vector.extract_strided_slice %40 {offsets = [2, 0, 0], sizes = [1, 8, 8], strides = [1, 1, 1]} : vector<4x8x8xf32> to vector<1x8x8xf32>
      %46 = vector.shape_cast %45 : vector<1x8x8xf32> to vector<8x8xf32>
      %47 = vector.extract_strided_slice %40 {offsets = [3, 0, 0], sizes = [1, 8, 8], strides = [1, 1, 1]} : vector<4x8x8xf32> to vector<1x8x8xf32>
      %48 = vector.shape_cast %47 : vector<1x8x8xf32> to vector<8x8xf32>
      %49 = tpu.concatenate %42, %44, %46, %48 in 1 : vector<8x8xf32>, vector<8x8xf32>, vector<8x8xf32>, vector<8x8xf32> -> vector<8x32xf32>
      %50 = arith.truncf %49 : vector<8x32xf32> to vector<8x32xbf16>
      %c0_41 = arith.constant 0 : index
      %c0_42 = arith.constant 0 : index
      %c0_43 = arith.constant 0 : index
      %51 = vector.load %arg6[%c0_41, %c0_42, %c0_43] : memref<1x8x32xbf16, #tpu.memory_space<vmem>>, vector<1x8x32xbf16>
      %52 = vector.shape_cast %51 : vector<1x8x32xbf16> to vector<8x32xbf16>
      %53 = vector.shape_cast %50 : vector<8x32xbf16> to vector<1x8x32xbf16>
      tpu.vector_store %arg6[%c0_41, %c0_42, %c0_43], %53 {strides = array<i32>} : memref<1x8x32xbf16, #tpu.memory_space<vmem>>, vector<1x8x32xbf16>,
    } else {
    }
    return
  }
  func.func @transform_0(%arg0: i32, %arg1: i32, %arg2: i32) -> (i32, i32, i32, i32) {
    %c0_i32 = arith.constant 0 : i32
    %c0_i32_0 = arith.constant 0 : i32
    %c0_i32_1 = arith.constant 0 : i32
    return %arg0, %c0_i32, %arg1, %c0_i32_0 : i32, i32, i32, i32
  }
  func.func @transform_1(%arg0: i32, %arg1: i32, %arg2: i32) -> (i32, i32, i32, i32) {
    %c0_i32 = arith.constant 0 : i32
    %c0_i32_0 = arith.constant 0 : i32
    %c0_i32_1 = arith.constant 0 : i32
    return %arg0, %c0_i32, %arg2, %c0_i32_0 : i32, i32, i32, i32
  }
  func.func @transform_2(%arg0: i32, %arg1: i32, %arg2: i32) -> (i32, i32, i32, i32) {
    %c0_i32 = arith.constant 0 : i32
    %c0_i32_0 = arith.constant 0 : i32
    %c0_i32_1 = arith.constant 0 : i32
    return %arg0, %c0_i32, %arg2, %c0_i32_0 : i32, i32, i32, i32
  }
  func.func @transform_3(%arg0: i32, %arg1: i32, %arg2: i32) -> (i32, i32, i32) {
    %c0_i32 = arith.constant 0 : i32
    %c0_i32_0 = arith.constant 0 : i32
    return %arg0, %arg1, %c0_i32 : i32, i32, i32
  }
}

module attributes {stable_mosaic.version = 11 : i64} {
  func.func @_out_proj_kernel(%arg0: i32, %arg1: i32, %arg2: memref<1x8x32xbf16, #tpu.memory_space<vmem>>, %arg3: memref<32x32xbf16, #tpu.memory_space<vmem>>, %arg4: memref<1x32xf32, #tpu.memory_space<vmem>>, %arg5: memref<1x8x32xf32, #tpu.memory_space<vmem>>) attributes {dimension_semantics = [#tpu.dimension_semantics<parallel>, #tpu.dimension_semantics<parallel>], iteration_bounds = array<i64: 2, 1>, scalar_prefetch = 0 : i64, scratch_operands = 0 : i64, tpu.core_type = #tpu.core_type<tc>, window_params = [{transform_indices = @transform_0, window_bounds = array<i64: 1, 8, 32>}, {pipeline_mode = #tpu.pipeline_mode<synchronous>, transform_indices = @transform_1, window_bounds = array<i64: 32, 32>}, {pipeline_mode = #tpu.pipeline_mode<synchronous>, transform_indices = @transform_2, window_bounds = array<i64: 1, 32>}, {transform_indices = @transform_3, window_bounds = array<i64: 1, 8, 32>}]} {
    %c0 = arith.constant 0 : index
    %c0_0 = arith.constant 0 : index
    %c0_1 = arith.constant 0 : index
    %0 = vector.load %arg2[%c0, %c0_0, %c0_1] : memref<1x8x32xbf16, #tpu.memory_space<vmem>>, vector<1x8x32xbf16>
    %1 = vector.shape_cast %0 : vector<1x8x32xbf16> to vector<8x32xbf16>
    %c0_2 = arith.constant 0 : index
    %c0_3 = arith.constant 0 : index
    %2 = vector.load %arg3[%c0_2, %c0_3] : memref<32x32xbf16, #tpu.memory_space<vmem>>, vector<32x32xbf16>
    %cst = arith.constant dense<0.000000e+00> : vector<8x32xf32>
    %3 = tpu.matmul %1, %2, %cst {dimension_numbers = #tpu.dot_dimension_numbers<[1], [0], [0], [1], [0, 0, 1, 1], [], []>} : vector<8x32xbf16>, vector<32x32xbf16>, vector<8x32xf32> -> vector<8x32xf32>
    %c0_4 = arith.constant 0 : index
    %c0_5 = arith.constant 0 : index
    %4 = vector.load %arg4[%c0_4, %c0_5] : memref<1x32xf32, #tpu.memory_space<vmem>>, vector<1x32xf32>
    %5 = vector.broadcast %4 : vector<1x32xf32> to vector<8x32xf32>
    %6 = arith.addf %3, %5 : vector<8x32xf32>
    %c0_6 = arith.constant 0 : index
    %c0_7 = arith.constant 0 : index
    %c0_8 = arith.constant 0 : index
    %7 = vector.load %arg5[%c0_6, %c0_7, %c0_8] : memref<1x8x32xf32, #tpu.memory_space<vmem>>, vector<1x8x32xf32>
    %8 = vector.shape_cast %7 : vector<1x8x32xf32> to vector<8x32xf32>
    %9 = vector.shape_cast %6 : vector<8x32xf32> to vector<1x8x32xf32>
    tpu.vector_store %arg5[%c0_6, %c0_7, %c0_8], %9 {strides = array<i32>} : memref<1x8x32xf32, #tpu.memory_space<vmem>>, vector<1x8x32xf32>,
    return
  }
  func.func @transform_0(%arg0: i32, %arg1: i32) -> (i32, i32, i32) {
    %c0_i32 = arith.constant 0 : i32
    %c0_i32_0 = arith.constant 0 : i32
    return %arg0, %arg1, %c0_i32 : i32, i32, i32
  }
  func.func @transform_1(%arg0: i32, %arg1: i32) -> (i32, i32) {
    %c0_i32 = arith.constant 0 : i32
    %c0_i32_0 = arith.constant 0 : i32
    %c0_i32_1 = arith.constant 0 : i32
    return %c0_i32, %c0_i32_0 : i32, i32
  }
  func.func @transform_2(%arg0: i32, %arg1: i32) -> (i32, i32) {
    %c0_i32 = arith.constant 0 : i32
    %c0_i32_0 = arith.constant 0 : i32
    %c0_i32_1 = arith.constant 0 : i32
    return %c0_i32, %c0_i32_0 : i32, i32
  }
  func.func @transform_3(%arg0: i32, %arg1: i32) -> (i32, i32, i32) {
    %c0_i32 = arith.constant 0 : i32
    %c0_i32_0 = arith.constant 0 : i32
    return %arg0, %arg1, %c0_i32 : i32, i32, i32
  }
}

</mosaic_0001>

<bundles_post_ra>
// kernel: self_attention.5
= control target key start
LH: loop header
LB: loop body
LE: loop exit
PB: predicated region body
PF: predicated region fallthrough
CT: control target
= control target key end

     0   :  { %8 = vsyncpa [#allocation3], 0  ;;  %s603_s0 = inlined_call_operand.vmem [shape: bf16[2,8,32], index: 0, kind: input, shape index: {}]   ;;  %s604_s1 = inlined_call_operand.vmem [shape: bf16[32,32], index: 1, kind: input, shape index: {}]   ;;  %s605_s2 = inlined_call_operand.vmem [shape: f32[1,32], index: 2, kind: input, shape index: {}]   ;;  %s606_s3 = inlined_call_operand.hbm [shape: f32[2,8,32], index: 3, kind: output, shape index: {}]  }
   0x1   :  { %10 = vsyncpa [#allocation3 + $0x1], 0  ;;  %s497_s12 = smov 0   ;;  %s499_s13 = smov 0  }
   0x2   :  { %s501_s14 = smov 0   ;;  %s503_s15 = smov 0  }
   0x3   :  { %s505_s16 = smov 0   ;;  %s507_s17 = smov 0  }
   0x4 LB: > { %s319_s18 = sadd.s32 4294967295, %s475_s17   ;;  %s320_s19 = sadd.s32 4294967294, %s475_s17   ;;  %s475_s17 = sphi %s507_s17, %s16_s17   ;;  %s471_s16 = sphi %s505_s16, %s613_s16   ;;  %s467_s15 = sphi %s503_s15, %s612_s15   ;;  %s463_s14 = sphi %s501_s14, %s611_s14   ;;  %s459_s13 = sphi %s499_s13, %s610_s13   ;;  %s455_s12 = sphi %s497_s12, %s609_s12  }
   0x5   : > { %s28_s20 = sadd.s32 1, %s471_s16  ;;  %s107_s21 = sadd.s32 1, %s463_s14 }
   0x6   : > { %p30_p0 = scmp.ge.s32.totalorder %s28_s20, 2  ;;  %p117_p1 = scmp.ne.s32.totalorder %s463_s14, %s459_s13 }
   0x7   : > { %p118_p2 = scmp.eq.s32.totalorder %s319_s18, 1  ;;  %p123_p3 = scmp.ne.s32.totalorder %s459_s13, %s455_s12 }
   0x8   : > { %s615_s20 = smov (%p30_p0, %s28_s20), 0  ;;  %p124_p5 = scmp.eq.s32.totalorder %s320_s19, 1 }
   0x9   : > { %p537_p4 = por %p118_p2, %p117_p1  ;;  %s102_s23 = ssub.s32 %s471_s16, %s615_s20 }
   0xa   : > { %p323_p6 = scmp.ge.s32.totalorder %s475_s17, 1  ;;  %p105_p7 = scmp.eq.s32.totalorder %s102_s23, 0 }
   0xb   : > { %p544_p8 = por %p124_p5, %p123_p3  ;;  %p158_p9 = scmp.lt.s32.totalorder %s475_s17, 3 }
   0xc   : > { %s550_s25 = scalar_select %p105_p7, %s463_s14, %s107_s21  }
   0xd   : > { %p159_p10 = pnand %p323_p6, %p158_p9 }
   0xe   : > { %p184_p11 = scmp.lt.s32.totalorder (!%p159_p10), %s467_s15, 1  ;;  %s181_s8 = sand.u32 (!%p159_p10), 1, %s459_s13  }
   0xf   : > { %162 = sbr.rel (%p159_p10) target bundleno = 162 (0xa2), region = 32  ;;  %s336_s9 = sshll.u32 (!%p159_p10), %s467_s15, 3 }
  0x10   : > { %s324_s10 = sshll.u32 (!%p159_p10), %s181_s8, 3  ;;  %s243_s19 = scalar_lea.hbm (!%p159_p10), %s606_s3, %s336_s9 }
  0x11   : > { %s183_s26 = scalar_lea.vmem (!%p159_p10), [#allocation2], %s324_s10  ;;  %s247_s28 = sshll.u32 (!%p159_p10), %s243_s19, 4  ;;  %s248_s28 = int_to_ptr.hbm [resolvable:$true] %s247_s28 }
  0x12   : > { %s245_s27 = sshll.u32 (!%p159_p10), %s183_s26, 4  ;;  %s232_s29 = scalar_lea.sflag (!%p159_p10), [#allocation3], %s181_s8  ;;  %s246_s27 = int_to_ptr.vmem [resolvable:$true] %s245_s27 }
  0x13   : > { %s417_s6 = scalar_lea.hbm (!%p159_p10), %s606_s3, 16 }
  0x14   : > { %v340_v0 = vld [vmem:[%s604_s1 + $0x8] sm:$0xff]  ;;  %v339_v1 = vld [vmem:[%s604_s1] sm:$0xff]  ;;  %s185_s30 = scalar_select %p184_p11, %s467_s15, 1  ;;  %vm213_vm0 = vcmask 261120  }
  0x15   : > { %223 = vmatpush.bf16.msra.mxu0 %v340_v0  ;;  %v396_v3 = vld [vmem:[%s605_s2] ss:$0 sm:$0xff]  ;;  %s411_s15 = sshra.s32 %s248_s28, 4  ;;  %s412_s15 = int_to_ptr.hbm [resolvable:$true] %s411_s15 }
  0x16   : > { %s325_s4 = sshll.u32 %s185_s30, 2  ;;  %s413_s30 = scalar_lea.hbm %s412_s15, 8 }
  0x17   : > { %s190_s7 = scalar_lea.vmem %s603_s0, %s325_s4  ;;  %p414_p12 = scmp.ne.s32.totalorder %s412_s15, %s413_s30 }
  0x18   : > { %v192_v2 = vld [vmem:[%s190_s7] sm:$0xf]  ;;  %p418_p1 = scmp.lt.s32.totalorder %s412_s15, %s606_s3  ;;  %p419_p2 = scmp.lt.s32.totalorder %s417_s6, %s413_s30 }
  0x19   : > { %224 = vmatpush.bf16.msra.mxu0 %v339_v1  ;;  %p415_p13 = pnand %p414_p12, %p537_p4 }
  0x1a   : > { %p420_p3 = por %p419_p2, %p418_p1 }
  0x1b   : > { %p416_p0 = pneg %p415_p13 }
  0x1c   : > { %334 = vmatmul.msk.bf16.vlgmr.msra.gmra.mxu0 %vm213_vm0, %v192_v2 }
  0x1d   : > { %p421_p5 = pnand %p420_p3, %p416_p0 }
  0x99   : > { %v226_v4 = vpop.f32.mrf.mxu0 }
  0x9a   : > { %v227_v5 = vadd.f32 %v396_v3, %v226_v4 }
  0x9c   : > { %230 = vst.msk [vmem:[%s183_s26] sm:$0xff] %vm213_vm0, %v227_v5 }
  0x9d   : > { %424 = shalt.err (!%p421_p5)
}
  0x9e   : > { %341 = dma.vmem_to_hbm [thread:$0]  (%p537_p4), %s246_s27, 128, %s248_s28, %s232_s29  }
  0xa1   : > { %v228_v6 = vpop.f32.mrf.mxu0 }
  0xa2 PF: > { %p347_p6 = scmp.ge.s32.totalorder %s475_s17, 2  ;;  %s259_s8 = sand.u32 1, %s455_s12  }
  0xa3   : > { %s260_s10 = scalar_lea.sflag [#allocation3], %s259_s8 }
  0xa4   : > { %p344_p7 = pnand %p347_p6, %p544_p8 }
  0xa6   : > { %p345_p9 = pneg %p344_p7 }
  0xa8   : > { %450 = dma.done.wait (%p345_p9), %s260_s10, 128  }
  0xa9   : > { %452 = vsyncadd (%p345_p9), %s260_s10, 4294967168  ;;  %s16_s17 = sadd.s32 1, %s475_s17   ;;  %s609_s12 = smov %s459_s13 }
  0xaa   : > { %p13_p10 = scmp.ge.s32.totalorder %s16_s17, 4   ;;  %s610_s13 = smov %s463_s14 }
  0xab   : > { %s611_s14 = smov %s550_s25  ;;  %s612_s15 = smov %s471_s16 }
  0xac   : > { %s613_s16 = smov %s615_s20  ;;  %15 = sbr.rel (!%p13_p10) target bundleno = 4 (0x4), region = 67 }
  0xb1   :  { %266 = vsyncpa [#allocation3], 1 }
  0xb2   :  { %268 = vsyncpa [#allocation3 + $0x1], 1 }

// kernel: self_attention.3
= control target key start
LH: loop header
LB: loop body
LE: loop exit
PB: predicated region body
PF: predicated region fallthrough
CT: control target
= control target key end

     0   :  { %s809_s30 = smov 0   ;;  %s811_s10 = smov 0   ;;  %s881_s0 = inlined_call_operand.vmem [shape: bf16[2,8,32], index: 0, kind: input, shape index: {}]   ;;  %s882_s1 = inlined_call_operand.vmem [shape: bf16[32,32], index: 1, kind: input, shape index: {}]   ;;  %s883_s2 = inlined_call_operand.vmem [shape: bf16[32,32], index: 2, kind: input, shape index: {}]   ;;  %s884_s3 = inlined_call_operand.vmem [shape: bf16[32,32], index: 3, kind: input, shape index: {}]   ;;  %s885_s4 = inlined_call_operand.vmem [shape: f32[1,32], index: 4, kind: input, shape index: {}]   ;;  %s886_s5 = inlined_call_operand.vmem [shape: f32[1,32], index: 5, kind: input, shape index: {}]   ;;  %s887_s6 = inlined_call_operand.vmem [shape: f32[1,32], index: 6, kind: input, shape index: {}]   ;;  %s888_s7 = inlined_call_operand.vmem [shape: bf16[2,8,32], index: 7, kind: output, shape index: {0}]   ;;  %s889_s8 = inlined_call_operand.vmem [shape: bf16[2,8,32], index: 8, kind: output, shape index: {1}]   ;;  %s890_s9 = inlined_call_operand.vmem [shape: bf16[2,8,32], index: 9, kind: output, shape index: {2}]  }
   0x1   :  { %s813_s11 = smov 0  }
   0x2 LB: > { %s32_s12 = sadd.s32 1, %s753_s10  ;;  %p668_p0 = scmp.ge.s32.totalorder %s757_s11, 1  ;;  %s757_s11 = sphi %s813_s11, %s20_s11   ;;  %s753_s10 = sphi %s811_s10, %s892_s10   ;;  %s749_s30 = sphi %s809_s30, %s891_s30  }
   0x3   : > { %p34_p1 = scmp.ge.s32.totalorder %s32_s12, 2  ;;  %p314_p2 = scmp.lt.s32.totalorder %s757_s11, 3 }
   0x5   : > { %s894_s12 = smov (%p34_p1, %s32_s12), 0  ;;  %p315_p3 = pnand %p668_p0, %p314_p2 }
   0x6   : > { %p368_p4 = scmp.lt.s32.totalorder (!%p315_p3), %s749_s30, 1 }
   0x7   : > { %318 = sbr.rel (%p315_p3) target bundleno = 162 (0xa2), region = 48 }
   0xc   : > { %v703_v0 = vld [vmem:[%s882_s1 + $0x8] sm:$0xff]  ;;  %v702_v3 = vld [vmem:[%s882_s1] sm:$0xff]  ;;  %s896_s30 = smov (!%p368_p4, %s749_s30), 1  ;;  %vm418_vm0 = vcmask 261120   ;;  %vm502_vm1 = vcmask 257024  }
   0xd   : > { %v705_v1 = vld [vmem:[%s883_s2 + $0x8] sm:$0xff]  ;;  %428 = vmatpush.bf16.msra.mxu0 %v703_v0  ;;  %v704_v4 = vld [vmem:[%s883_s2] sm:$0xff]  ;;  %s845_s25 = sshll.u32 %s896_s30, 2 }
   0xe   : > { %v707_v2 = vld [vmem:[%s884_s3 + $0x8] sm:$0xff]  ;;  %461 = vmatpush.bf16.msra.mxu1 %v705_v1  ;;  %v706_v5 = vld [vmem:[%s884_s3] sm:$0xff]  ;;  %s374_s28 = scalar_lea.vmem %s881_s0, %s845_s25  ;;  %s381_s17 = scalar_lea.vmem %s888_s7, %s845_s25 }
   0xf   : > { %494 = vmatpush.bf16.msra.mxu2 %v707_v2  ;;  %v397_v6 = vld [vmem:[%s374_s28] sm:$0xf]  ;;  %s388_s20 = scalar_lea.vmem %s889_s8, %s845_s25  ;;  %s395_s26 = scalar_lea.vmem %s890_s9, %s845_s25 }
  0x10   : > { %v732_v7 = vld [vmem:[%s885_s4] ss:$0 sm:$0xff] }
  0x11   : > { %429 = vmatpush.bf16.msra.mxu0 %v702_v3  ;;  %v733_v8 = vld [vmem:[%s886_s5] ss:$0 sm:$0xff] }
  0x12   : > { %462 = vmatpush.bf16.msra.mxu1 %v704_v4  ;;  %v734_v15 = vld [vmem:[%s887_s6] ss:$0 sm:$0xff] }
  0x13   : > { %495 = vmatpush.bf16.msra.mxu2 %v706_v5 }
  0x14   : > { %681 = vmatmul.msk.bf16.vlgmr.msra.gmra.mxu0 %vm418_vm0, %v397_v6 }
  0x15   : > { %690 = vmatmul.msk.bf16.vlgmr.msra.gmra.mxu1 %vm418_vm0, %v397_v6 }
  0x16   : > { %699 = vmatmul.msk.bf16.vlgmr.msra.gmra.mxu2 %vm418_vm0, %v397_v6 }
  0x91   : > { %v431_v9 = vpop.f32.mrf.mxu0 }
  0x92   : > { %v464_v10 = vpop.f32.mrf.mxu1  ;;  %v432_v11 = vadd.f32 %v732_v7, %v431_v9 }
  0x93   : > { %v465_v12 = vadd.f32 %v733_v8, %v464_v10 }
  0x94   : > { %v501_v13 = vpack.c.bf16 %v432_v11, %v432_v11 }
  0x95   : > { %v504_v14 = vpack.c.bf16 %v465_v12, %v465_v12 }
  0x96   : > { %503 = vst.msk [vmem:[%s381_s17] sm:$0xf] %vm502_vm1, %v501_v13 }
  0x97   : > { %505 = vst.msk [vmem:[%s388_s20] sm:$0xf] %vm502_vm1, %v504_v14 }
  0x99   : > { %v497_v16 = vpop.f32.mrf.mxu2  ;;  %v433_v18 = vpop.f32.mrf.mxu0 }
  0x9a   : > { %v498_v17 = vadd.f32 %v734_v15, %v497_v16  ;;  %v466_v19 = vpop.f32.mrf.mxu1 }
  0x9c   : > { %v506_v20 = vpack.c.bf16 %v498_v17, %v498_v17 }
  0x9e   : > { %507 = vst.msk [vmem:[%s395_s26] sm:$0xf] %vm502_vm1, %v506_v20 }
  0xa1   : > { %v499_v21 = vpop.f32.mrf.mxu2 }
  0xa2 PF: > { %s20_s11 = sadd.s32 1, %s757_s11   ;;  %s891_s30 = smov %s753_s10 }
  0xa3   : > { %p17_p5 = scmp.ge.s32.totalorder %s20_s11, 4   ;;  %s892_s10 = smov %s894_s12 }
  0xa5   :  { %19 = sbr.rel (!%p17_p5) target bundleno = 2 (0x2), region = 102 }

// kernel: self_attention.4
= control target key start
LH: loop header
LB: loop body
LE: loop exit
PB: predicated region body
PF: predicated region fallthrough
CT: control target
= control target key end

     0   :  { %s898_s12 = smov 0   ;;  %s900_s13 = smov 0   ;;  %s1032_s0 = inlined_call_operand.vmem [shape: bf16[2,4,8,8], index: 0, kind: input, shape index: {}]   ;;  %s1033_s1 = inlined_call_operand.vmem [shape: bf16[2,4,8,8], index: 1, kind: input, shape index: {}]   ;;  %s1034_s2 = inlined_call_operand.vmem [shape: bf16[2,4,8,8], index: 2, kind: input, shape index: {}]   ;;  %s1035_s3 = inlined_call_operand.vmem [shape: bf16[2,8,32], index: 3, kind: output, shape index: {}]  }
   0x1   :  { %s902_s14 = smov 0  }
   0x2 LB: > { %s32_s15 = sadd.s32 1, %s866_s13  ;;  %p770_p0 = scmp.ge.s32.totalorder %s870_s14, 1  ;;  %s870_s14 = sphi %s902_s14, %s13_s14   ;;  %s866_s13 = sphi %s900_s13, %s1037_s13   ;;  %s862_s12 = sphi %s898_s12, %s1036_s12  }
   0x3   : > { %p34_p1 = scmp.ge.s32.totalorder %s32_s15, 2  ;;  %p193_p2 = scmp.lt.s32.totalorder %s870_s14, 3 }
   0x5   : > { %s1039_s15 = smov (%p34_p1, %s32_s15), 0  ;;  %p194_p3 = pnand %p770_p0, %p193_p2 }
   0x6   : > { %p238_p4 = scmp.lt.s32.totalorder (!%p194_p3), %s862_s12, 1  ;;  %s875_s26 = smov (!%p194_p3), 16  }
   0x7   : > { %197 = sbr.rel (%p194_p3) target bundleno = 832 (0x340), region = 32  ;;  %s876_s27 = smov (!%p194_p3), 8  }
   0x8   : > { %s877_s28 = smov (!%p194_p3), 24  }
   0xc   : > { %s1041_s12 = smov (!%p238_p4, %s862_s12), 1  ;;  %vm283_vm0 = vcmask 64512   ;;  %vm274_vm1 = vcmask 7168   ;;  %v872_v11 = vmov -inf   ;;  %v873_v22 = vmov 0  }
   0xd   : > { %s919_s16 = sshll.u32 %s1041_s12, 4  ;;  %276 = vst.msk [vmem:[#allocation2 + $0x8] sm:$0xff] %vm274_vm1, %v872_v11  ;;  %823 = vset.pattern.permute.xlu0 %v873_v22  ;;  %821 = vset.pattern.permute.xlu1 %v873_v22  ;;  %v874_v23 = vmov 0.0   ;;  %vm505_vm2 = vcmask 1043456   ;;  %vm643_vm3 = vcmask 130048   ;;  %s777_s29 = sshll.u32 %s1041_s12, 2 }
   0xe   : > { %s253_s19 = scalar_lea.vmem %s1033_s1, %s919_s16  ;;  %s245_s22 = scalar_lea.vmem %s1032_s0, %s919_s16  ;;  %275 = vst.msk [vmem:[#allocation2] sm:$0xff] %vm274_vm1, %v872_v11  ;;  %822 = vset.pattern.permute.xlu2 %v873_v22  ;;  %vm645_vm4 = vcmask 195584   ;;  %vm648_vm5 = vcmask 257024  }
   0xf   : > { %v293_v0 = vld [vmem:[%s253_s19 + $0x4] sm:$0xf]  ;;  %v294_v1 = vld [vmem:[%s253_s19 + $0x8] sm:$0xf]  ;;  %v295_v2 = vld [vmem:[%s253_s19 + $0xc] sm:$0xf]  ;;  %s982_s25 = scalar_lea.vmem %s1034_s2, %s919_s16  ;;  %s268_s5 = scalar_lea.vmem %s1035_s3, %s777_s29 }
  0x10   : > { %v324_v3 = vsel %vm283_vm0, %v293_v0, 0  ;;  %v343_v4 = vsel %vm283_vm0, %v294_v1, 0  ;;  %v362_v5 = vsel %vm283_vm0, %v295_v2, 0  ;;  %v289_v6 = vld [vmem:[%s245_s22 + $0x4] sm:$0xf]  ;;  %277 = vst.msk [vmem:[#allocation2 + $0x10] sm:$0xff] %vm274_vm1, %v872_v11 }
  0x11   : > { %333 = vmatpush.bf16.xpose.msra.mxu1 %v324_v3  ;;  %352 = vmatpush.bf16.xpose.msra.mxu2 %v343_v4  ;;  %v290_v7 = vld [vmem:[%s245_s22 + $0x8] sm:$0xf]  ;;  %v291_v8 = vld [vmem:[%s245_s22 + $0xc] sm:$0xf]  ;;  %v292_v9 = vld [vmem:[%s253_s19] sm:$0xf] }
  0x12   : > { %371 = vmatpush.bf16.xpose.msra.mxu3 %v362_v5  ;;  %v305_v10 = vsel %vm283_vm0, %v292_v9, 0  ;;  %278 = vst.msk [vmem:[#allocation2 + $0x18] sm:$0xff] %vm274_vm1, %v872_v11  ;;  %v288_v12 = vld [vmem:[%s245_s22] sm:$0xf]  ;;  %v299_v39 = vld [vmem:[%s982_s25 + $0xc] sm:$0xf] }
  0x13   : > { %314 = vmatpush.bf16.xpose.msra.mxu0 %v305_v10  ;;  %282 = vst.msk [vmem:[#allocation3 + $0x18] sm:$0xff] %vm274_vm1, %v874_v23  ;;  %v564_v40 = vsel %vm505_vm2, %v299_v39, 0  ;;  %v297_v41 = vld [vmem:[%s982_s25 + $0x4] sm:$0xf]  ;;  %v298_v43 = vld [vmem:[%s982_s25 + $0x8] sm:$0xf] }
  0x14   : > { %279 = vst.msk [vmem:[#allocation3] sm:$0xff] %vm274_vm1, %v874_v23  ;;  %v958_v24 = vld [vmem:[#allocation2 + $0x8] sm:$0xff]  ;;  %v526_v42 = vsel %vm505_vm2, %v297_v41, 0  ;;  %v545_v44 = vsel %vm505_vm2, %v298_v43, 0 }
  0x15   : > { %280 = vst.msk [vmem:[#allocation3 + $0x8] sm:$0xff] %vm274_vm1, %v874_v23  ;;  %v377_v62 = vld [vmem:[#allocation2] sm:$0xff] }
  0x16   : > { %281 = vst.msk [vmem:[#allocation3 + $0x10] sm:$0xff] %vm274_vm1, %v874_v23 }
  0x17   : > { %284 = vst.msk [vmem:[#allocation4] sm:$0xff] %vm283_vm0, %v874_v23  ;;  %v970_v29 = vld [vmem:[#allocation2 + $0x10] sm:$0xff] }
  0x18   : > { %779 = vmatmul.msk.bf16.vlgmr.msra.gmra.mxu1 %vm283_vm0, %v289_v6  ;;  %780 = vmatmul.msk.bf16.vlgmr.msra.gmra.mxu2 %vm283_vm0, %v290_v7  ;;  %285 = vst.msk [vmem:[#allocation4 + $0x8] sm:$0xff] %vm283_vm0, %v874_v23 }
  0x19   : > { %781 = vmatmul.msk.bf16.vlgmr.msra.gmra.mxu3 %vm283_vm0, %v291_v8  ;;  %286 = vst.msk [vmem:[#allocation4 + $0x10] sm:$0xff] %vm283_vm0, %v874_v23  ;;  %v380_v34 = vld [vmem:[#allocation2 + $0x18] sm:$0xff]  ;;  %535 = vmatpush.bf16.msrb.mxu1 %v526_v42 }
  0x1a   : > { %778 = vmatmul.msk.bf16.vlgmr.msra.gmra.mxu0 %vm283_vm0, %v288_v12  ;;  %287 = vst.msk [vmem:[#allocation4 + $0x18] sm:$0xff] %vm283_vm0, %v874_v23  ;;  %573 = vmatpush.bf16.msrb.mxu3 %v564_v40  ;;  %v444_v5 = vld [vmem:[#allocation3 + $0x18] sm:$0xff] }
  0x1b   : > { %554 = vmatpush.bf16.msrb.mxu2 %v545_v44 }
  0x1c   : > { %v442_v39 = vld [vmem:[#allocation3 + $0x8] sm:$0xff] }
  0x1d   : > { %v443_v12 = vld [vmem:[#allocation3 + $0x10] sm:$0xff] }
  0x95   : > { %v941_v13 = vpop.f32.mrf.mxu1 }
  0x96   : > { %v384_v14 = vsel %vm283_vm0, %v941_v13, -inf }
  0x97   : > { %385 = vmax.xlane.f32.xlu1 %v384_v14  ;;  %v963_v27 = vpop.f32.mrf.mxu0 }
  0x98   : > { %v381_v38 = vsel %vm283_vm0, %v963_v27, -inf }
  0x9b   : > { %v945_v15 = vpop.f32.mrf.mxu2 }
  0x9c   : > { %v373_v16 = vpop.f32.mrf.mxu3  ;;  %v387_v17 = vsel %vm283_vm0, %v945_v15, -inf }
  0x9d   : > { %388 = vmax.xlane.f32.xlu0 %v387_v17  ;;  %v337_v18 = vpop.f32.mrf.mxu1  ;;  %v390_v19 = vsel %vm283_vm0, %v373_v16, -inf }
  0x9f   : > { %v318_v33 = vpop.f32.mrf.mxu0 }
  0xa3   : > { %v356_v20 = vpop.f32.mrf.mxu2 }
  0xa4   : > { %v375_v21 = vpop.f32.mrf.mxu3 }
  0xa5   : > { %391 = vmax.xlane.f32.xlu0 %v390_v19  ;;  %v296_v21 = vld [vmem:[%s982_s25] sm:$0xf] }
  0xa6   : > { %v507_v23 = vsel %vm505_vm2, %v296_v21, 0 }
  0xa7   : > { %516 = vmatpush.bf16.msrb.mxu0 %v507_v23 }
 0x10a   : > { %v386_v25 = vpop.xlane.xlu1 %385 }
 0x10b   : > { %v961_v26 = vmax.f32 %v958_v24, %v386_v25 }
 0x10d   : > { %v398_v28 = vsub.f32 %v958_v24, %v961_v26  ;;  %588 = vst.msk [vmem:[#allocation2 + $0x8] sm:$0xff] %vm274_vm1, %v961_v26  ;;  %416 = vperm.xlu0 %823, %v961_v26  }
 0x110   : > { %v389_v30 = vpop.xlane.xlu0 %388 }
 0x111   : > { %v395_v31 = vmax.f32 %v970_v29, %v389_v30 }
 0x113   : > { %v399_v32 = vsub.f32 %v970_v29, %v395_v31  ;;  %589 = vst.msk [vmem:[#allocation2 + $0x10] sm:$0xff] %vm274_vm1, %v395_v31  ;;  %421 = vperm.xlu1 %821, %v395_v31  }
 0x115   : > { %v405_v6 = vmul.f32 1.442695, %v399_v32 }
 0x118   : > { %v392_v35 = vpop.xlane.xlu0 %391 }
 0x119   : > { %v396_v36 = vmax.f32 %v380_v34, %v392_v35 }
 0x11b   : > { %v400_v37 = vsub.f32 %v380_v34, %v396_v36  ;;  %590 = vst.msk [vmem:[#allocation2 + $0x18] sm:$0xff] %vm274_vm1, %v396_v36  ;;  %426 = vperm.xlu2 %822, %v396_v36  }
 0x11d   : > { %v407_v3 = vmul.f32 1.442695, %v400_v37  ;;  %v403_v37 = vmul.f32 1.442695, %v398_v28 }
 0x144   : > { %382 = vmax.xlane.f32.xlu2 %v381_v38 }
 0x175   : > { %v427_v45 = vpop.permute.xlu2 %426 }
 0x176   : > { %v432_v46 = vsub.f32 %v373_v16, %v427_v45  ;;  %v472_v45 = vld [vmem:[#allocation4 + $0x10] sm:$0xff] }
 0x178   : > { %v439_v47 = vmul.f32 1.442695, %v432_v46 }
 0x17a   : > { %824 = vpow2.f32 %v439_v47 }
 0x17f   : > { %v417_v48 = vpop.permute.xlu0 %416 }
 0x180   : > { %v825_v49 = vpop.eup %824  ;;  %v430_v50 = vsub.f32 %v941_v13, %v417_v48 }
 0x181   : > { %v458_v51 = vsel %vm283_vm0, %v825_v49, 0.0  ;;  %v501_v52 = vpack.c.bf16 %v825_v49, %v825_v49 }
 0x182   : > { %v435_v53 = vmul.f32 1.442695, %v430_v50  ;;  %459 = vadd.xlane.f32.xlu0 %v458_v51  ;;  %v441_v50 = vld [vmem:[#allocation3] sm:$0xff] }
 0x183   : > { %785 = vmatmul.msk.bf16.vlgmr.msrb.gmra.mxu3 %vm283_vm0, %v501_v52 }
 0x184   : > { %826 = vpow2.f32 %v435_v53 }
 0x185   : > { %v422_v54 = vpop.permute.xlu1 %421 }
 0x186   : > { %v431_v55 = vsub.f32 %v945_v15, %v422_v54  ;;  %v471_v54 = vld [vmem:[#allocation4 + $0x8] sm:$0xff] }
 0x188   : > { %v437_v56 = vmul.f32 1.442695, %v431_v55  ;;  %v470_v55 = vld [vmem:[#allocation4] sm:$0xff] }
 0x18a   : > { %v827_v57 = vpop.eup %826  ;;  %828 = vpow2.f32 %v437_v56 }
 0x18b   : > { %v499_v58 = vpack.c.bf16 %v827_v57, %v827_v57  ;;  %v452_v2 = vsel %vm283_vm0, %v827_v57, 0.0  ;;  %830 = vpow2.f32 %v407_v3 }
 0x18c   : > { %832 = vpow2.f32 %v405_v6 }
 0x18d   : > { %783 = vmatmul.msk.bf16.vlgmr.msrb.gmra.mxu1 %vm283_vm0, %v499_v58 }
 0x190   : > { %v829_v59 = vpop.eup %828 }
 0x191   : > { %v455_v60 = vsel %vm283_vm0, %v829_v59, 0.0  ;;  %v500_v61 = vpack.c.bf16 %v829_v59, %v829_v59  ;;  %v831_v4 = vpop.eup %830 }
 0x192   : > { %456 = vadd.xlane.f32.xlu2 %v455_v60  ;;  %v448_v7 = vmul.f32 %v831_v4, %v444_v5  ;;  %v833_v11 = vpop.eup %832 }
 0x193   : > { %784 = vmatmul.msk.bf16.vlgmr.msrb.gmra.mxu2 %vm283_vm0, %v500_v61  ;;  %v447_v14 = vmul.f32 %v833_v11, %v443_v12 }
 0x1b7   : > { %v383_v63 = vpop.xlane.xlu2 %382 }
 0x1b8   : > { %v393_v0 = vmax.f32 %v377_v62, %v383_v63 }
 0x1ba   : > { %v397_v1 = vsub.f32 %v377_v62, %v393_v0  ;;  %587 = vst.msk [vmem:[#allocation2] sm:$0xff] %vm274_vm1, %v393_v0  ;;  %411 = vperm.xlu1 %821, %v393_v0   ;;  %v473_v0 = vld [vmem:[#allocation4 + $0x18] sm:$0xff] }
 0x1bc   : > { %v401_v10 = vmul.f32 1.442695, %v397_v1 }
 0x1be   : > { %834 = vpow2.f32 %v401_v10 }
 0x1c4   : > { %v835_v13 = vpop.eup %834 }
 0x1c5   : > { %v445_v51 = vmul.f32 %v835_v13, %v441_v50 }
 0x1e4   : > { %453 = vadd.xlane.f32.xlu1 %v452_v2 }
 0x1f5   : > { %v460_v8 = vpop.xlane.xlu0 %459 }
 0x1f6   : > { %v464_v9 = vadd.f32 %v460_v8, %v448_v7 }
 0x1f8   : > { %469 = vst.msk [vmem:[#allocation3 + $0x18] sm:$0xff] %vm274_vm1, %v464_v9 }
 0x1fd   : > { %486 = vperm.xlu1 %821, %v833_v11  }
 0x1ff   : > { %v601_v43 = vld [vmem:[#allocation3 + $0x18] sm:$0xff] }
 0x205   : > { %476 = vperm.xlu1 %821, %v835_v13   ;;  %v457_v15 = vpop.xlane.xlu2 %456 }
 0x206   : > { %v463_v16 = vadd.f32 %v457_v15, %v447_v14  ;;  %v1000_v17 = vpop.f32.mrf.mxu3 }
 0x208   : > { %468 = vst.msk [vmem:[#allocation3 + $0x10] sm:$0xff] %vm274_vm1, %v463_v16 }
 0x20a   : > { %v537_v18 = vpop.f32.mrf.mxu1 }
 0x20e   : > { %v577_v19 = vpop.f32.mrf.mxu3 }
 0x20f   : > { %v600_v20 = vld [vmem:[#allocation3 + $0x10] sm:$0xff] }
 0x210   : > { %836 = vrcp.f32 %v600_v20 }
 0x212   : > { %v539_v22 = vpop.f32.mrf.mxu1 }
 0x216   : > { %v837_v25 = vpop.eup %836  ;;  %v556_v29 = vpop.f32.mrf.mxu2 }
 0x217   : > { %618 = vperm.xlu0 %823, %v837_v25  }
 0x21e   : > { %v558_v30 = vpop.f32.mrf.mxu2 }
 0x22c   : > { %v412_v31 = vpop.permute.xlu1 %411 }
 0x22d   : > { %v429_v32 = vsub.f32 %v963_v27, %v412_v31 }
 0x22f   : > { %v433_v33 = vmul.f32 1.442695, %v429_v32 }
 0x231   : > { %838 = vpow2.f32 %v433_v33 }
 0x232   : > { %840 = vpow2.f32 %v403_v37 }
 0x237   : > { %v839_v34 = vpop.eup %838 }
 0x238   : > { %v449_v35 = vsel %vm283_vm0, %v839_v34, 0.0  ;;  %v498_v36 = vpack.c.bf16 %v839_v34, %v839_v34  ;;  %v841_v38 = vpop.eup %840 }
 0x239   : > { %450 = vadd.xlane.f32.xlu2 %v449_v35  ;;  %v446_v40 = vmul.f32 %v841_v38, %v442_v39 }
 0x23a   : > { %782 = vmatmul.msk.bf16.vlgmr.msrb.gmra.mxu0 %vm283_vm0, %v498_v36 }
 0x251   : > { %481 = vperm.xlu2 %822, %v841_v38  }
 0x257   : > { %v454_v41 = vpop.xlane.xlu1 %453 }
 0x258   : > { %v462_v27 = vadd.f32 %v454_v41, %v446_v40 }
 0x259   : > { %491 = vperm.xlu2 %822, %v831_v4  }
 0x25a   : > { %467 = vst.msk [vmem:[#allocation3 + $0x8] sm:$0xff] %vm274_vm1, %v462_v27 }
 0x261   : > { %v599_v42 = vld [vmem:[#allocation3 + $0x8] sm:$0xff] }
 0x262   : > { %842 = vrcp.f32 %v599_v42 }
 0x263   : > { %844 = vrcp.f32 %v601_v43 }
 0x268   : > { %v843_v44 = vpop.eup %842 }
 0x269   : > { %613 = vperm.xlu2 %822, %v843_v44   ;;  %v845_v24 = vpop.eup %844 }
 0x26f   : > { %v487_v46 = vpop.permute.xlu1 %486 }
 0x270   : > { %v496_v26 = vmul.f32 %v487_v46, %v472_v45 }
 0x271   : > { %623 = vperm.xlu2 %822, %v845_v24  }
 0x272   : > { %v581_v28 = vadd.f32 %v556_v29, %v496_v26 }
 0x274   : > { %585 = vst.msk [vmem:[#allocation4 + $0x10] sm:$0xff] %vm283_vm0, %v581_v28 }
 0x277   : > { %v477_v56 = vpop.permute.xlu1 %476 }
 0x278   : > { %v494_v59 = vmul.f32 %v477_v56, %v470_v55 }
 0x27b   : > { %v596_v47 = vld [vmem:[#allocation4 + $0x10] sm:$0xff] }
 0x289   : > { %v619_v48 = vpop.permute.xlu0 %618 }
 0x28a   : > { %v628_v49 = vmul.f32 %v619_v48, %v596_v47 }
 0x28c   : > { %635 = vrot.lane.b32.xlu0 %v628_v49, %s875_s26 }
 0x2ac   : > { %v451_v52 = vpop.xlane.xlu2 %450 }
 0x2ad   : > { %v461_v53 = vadd.f32 %v451_v52, %v445_v51 }
 0x2af   : > { %466 = vst.msk [vmem:[#allocation3] sm:$0xff] %vm274_vm1, %v461_v53 }
 0x2b4   : > { %v482_v57 = vpop.permute.xlu2 %481 }
 0x2b5   : > { %v495_v58 = vmul.f32 %v482_v57, %v471_v54 }
 0x2b6   : > { %v598_v60 = vld [vmem:[#allocation3] sm:$0xff] }
 0x2b7   : > { %v580_v61 = vadd.f32 %v537_v18, %v495_v58  ;;  %v518_v62 = vpop.f32.mrf.mxu0  ;;  %846 = vrcp.f32 %v598_v60 }
 0x2b8   : > { %v579_v63 = vadd.f32 %v518_v62, %v494_v59 }
 0x2b9   : > { %584 = vst.msk [vmem:[#allocation4 + $0x8] sm:$0xff] %vm283_vm0, %v580_v61 }
 0x2ba   : > { %583 = vst.msk [vmem:[#allocation4] sm:$0xff] %vm283_vm0, %v579_v63 }
 0x2bc   : > { %v492_v1 = vpop.permute.xlu2 %491 }
 0x2bd   : > { %v847_v2 = vpop.eup %846  ;;  %v497_v3 = vmul.f32 %v492_v1, %v473_v0 }
 0x2be   : > { %608 = vperm.xlu2 %822, %v847_v2  }
 0x2bf   : > { %v582_v4 = vadd.f32 %v1000_v17, %v497_v3  ;;  %v520_v5 = vpop.f32.mrf.mxu0 }
 0x2c0   : > { %v595_v6 = vld [vmem:[#allocation4 + $0x8] sm:$0xff] }
 0x2c1   : > { %586 = vst.msk [vmem:[#allocation4 + $0x18] sm:$0xff] %vm283_vm0, %v582_v4  ;;  %v594_v13 = vld [vmem:[#allocation4] sm:$0xff] }
 0x2c4   : > { %v614_v7 = vpop.permute.xlu2 %613 }
 0x2c5   : > { %v627_v8 = vmul.f32 %v614_v7, %v595_v6 }
 0x2c7   : > { %631 = vrot.lane.b32.xlu1 %v627_v8, %s876_s27 }
 0x2c8   : > { %v597_v9 = vld [vmem:[#allocation4 + $0x18] sm:$0xff] }
 0x2cc   : > { %v624_v10 = vpop.permute.xlu2 %623 }
 0x2cd   : > { %v629_v11 = vmul.f32 %v624_v10, %v597_v9 }
 0x2cf   : > { %639 = vrot.lane.b32.xlu2 %v629_v11, %s877_s28 }
 0x2fe   : > { %v636_v16 = vpop.permute.xlu0 %635 }
 0x318   : > { %v609_v12 = vpop.permute.xlu2 %608 }
 0x319   : > { %v626_v14 = vmul.f32 %v609_v12, %v594_v13 }
 0x329   : > { %v640_v18 = vpop.permute.xlu2 %639 }
 0x339   : > { %v632_v15 = vpop.permute.xlu1 %631 }
 0x33a   : > { %v642_v17 = vsel %vm283_vm0, %v626_v14, %v632_v15 }
 0x33b   : > { %v644_v19 = vsel %vm643_vm3, %v642_v17, %v636_v16 }
 0x33c   : > { %v646_v20 = vsel %vm645_vm4, %v644_v19, %v640_v18 }
 0x33d   : > { %v647_v21 = vpack.c.bf16 %v646_v20, %v646_v20 }
 0x33f   : > { %649 = vst.msk [vmem:[%s268_s5] sm:$0xf] %vm648_vm5, %v647_v21 }
 0x340 PF: > { %s13_s14 = sadd.s32 1, %s870_s14   ;;  %s1036_s12 = smov %s866_s13 }
 0x341   : > { %p10_p5 = scmp.ge.s32.totalorder %s13_s14, 4   ;;  %s1037_s13 = smov %s1039_s15 }
 0x343   :  { %12 = sbr.rel (!%p10_p5) target bundleno = 2 (0x2), region = 76 }

</bundles_post_ra>
